<compile_context>
chip_gen: v7x
topology: tpu7x:2x2x1
jax: 0.10.0
libtpu: 0.0.40
codegen_flags: <defaults>
</compile_context>

<pallas_src>
import functools

import jax
import jax.numpy as jnp
from jax import lax
from jax.experimental import pallas as pl
from jax.experimental.pallas import tpu as pltpu


# ----------------------------------------------------------------------------
# Pallas kernel: whole UnitB forward for a block of Nb images
# Layout: rows = (n, h), lanes = (c, w) for x / out, lanes = (w, u) internally.
# ----------------------------------------------------------------------------
def unitb_kernel(x_ref, w1_ref, b1_ref, m_ref, b2_ref, w3_ref, b3_ref, o_ref,
                 *, h):
    x = x_ref[...]                                     # (Nb*H, C*W) f32
    cdt = w1_ref.dtype                                 # matmul operand dtype

    # --- conv1 (grouped 1x1) + BN1 + ReLU; shuffle + BN1 folded into w1 ------
    y = jnp.dot(x.astype(cdt), w1_ref[...],
                preferred_element_type=jnp.float32)    # (Nb*H, W*Cu)
    y = jnp.maximum(y + b1_ref[...], 0.0)

    # --- conv2: depthwise 3x3 + BN2 as ONE matmul on [y_up | y | y_dn] -------
    rows, wcu = y.shape
    zrow = jnp.zeros((1, wcu), jnp.float32)
    y_up = jnp.concatenate([zrow, y[:-1]], axis=0)     # input row h-1
    y_dn = jnp.concatenate([y[1:], zrow], axis=0)      # input row h+1
    rid = lax.broadcasted_iota(jnp.int32, (rows, wcu), 0) % h
    y_up = jnp.where(rid == 0, 0.0, y_up)              # zero across image seams
    y_dn = jnp.where(rid == h - 1, 0.0, y_dn)
    lhs = jnp.concatenate([y_up, y, y_dn], axis=1).astype(cdt)  # (Nb*H, 3*W*Cu)
    z = jnp.dot(lhs, m_ref[...],
                preferred_element_type=jnp.float32) + b2_ref[...]  # (Nb*H, W*Cu)

    # --- conv3 (grouped 1x1) + BN3, emitted straight in (c, w) lane layout ---
    out = jnp.dot(z.astype(cdt), w3_ref[...],
                  preferred_element_type=jnp.float32)  # (Nb*H, C*W)

    # --- residual + ReLU; single unmasked lane-dense store per block ---------
    o_ref[...] = jnp.maximum(out + b3_ref[...] + x, 0.0)


# ----------------------------------------------------------------------------
# Parameter folding helpers
# ----------------------------------------------------------------------------
def grouped_1x1_to_dense(w, groups):
    """w: (Cout, Cin_per_group) grouped 1x1 conv weight -> dense (Cin, Cout)."""
    cout, cin_pg = w.shape
    cin = cin_pg * groups
    cout_pg = cout // groups
    Wm = jnp.zeros((cin, cout), jnp.float32)
    for g in range(groups):
        blk = w[g * cout_pg:(g + 1) * cout_pg, :].T
        Wm = Wm.at[g * cin_pg:(g + 1) * cin_pg,
                   g * cout_pg:(g + 1) * cout_pg].set(blk)
    return Wm


def fold_bn(gamma, beta, mean, var, eps=1e-5):
    scale = gamma / jnp.sqrt(var + eps)
    bias = beta - mean * scale
    return scale.astype(jnp.float32), bias.astype(jnp.float32)


def shift_matrix(w, d):
    """S[w', w] = 1 iff w' == w + d with both in [0, w) (zero-pad boundary)."""
    S = jnp.zeros((w, w), jnp.float32)
    for col in range(w):
        row = col + d
        if 0 <= row < w:
            S = S.at[row, col].set(1.0)
    return S


def _pick_nb(n, h, cap=32):
    """Images per grid step: sublane-aligned block, grid >= 2 (v7x), big Nb."""
    cands = [d for d in range(1, min(n, cap) + 1) if n % d == 0]
    def score(nb):
        return ((nb * h) % 8 == 0 or nb == n,   # (8,128) block rule
                (n // nb) >= 2,                 # keep both v7x TCs busy
                nb)                             # amortize per-step overhead
    return max(cands, key=score)


# ----------------------------------------------------------------------------
# Wrapper: fold params, lay out data lane-dense, call pallas
# ----------------------------------------------------------------------------
@functools.partial(jax.jit, static_argnames=("groups",))
def unitb_pallas(x_nchw, params, groups):
    N, C, H, W = x_nchw.shape
    Cu = C // 4
    WCu = W * Cu
    CW = C * W

    (w1, g1, be1, m1, v1,
     w2, g2, be2, m2, v2,
     w3, g3, be3, m3, v3) = params

    # bf16 matmul operands only on a real TPU backend; the CPU / interpret
    # executor does not support BF16 x BF16 = F32 dots.
    cdt = jnp.bfloat16 if jax.default_backend() == "tpu" else jnp.float32

    eyeW = jnp.eye(W, dtype=jnp.float32)

    # --- conv1: fold BN1 scale and the channel shuffle into the weight -------
    w1d = grouped_1x1_to_dense(w1[:, :, 0, 0], groups)          # (C, Cu)
    s1, b1 = fold_bn(g1, be1, m1, v1)
    cpg = Cu // groups
    src = jnp.asarray([(u % groups) * cpg + (u // groups) for u in range(Cu)])
    w1f = (w1d * s1[None, :])[:, src]                           # (C, Cu)
    b1v = b1[src]                                               # (Cu,)
    # expand to lanes: rows (c, w'), cols (w, u) with delta_{w w'}
    w1big = jnp.einsum('cu,vw->cvwu', w1f, eyeW).reshape(CW, WCu).astype(cdt)
    b1big = jnp.tile(b1v, W).reshape(1, WCu)                    # lane (w,u)->b1[u]

    # --- conv2: depthwise 3x3 * BN2-scale as one stacked (3*WCu, WCu) matrix -
    s2, b2 = fold_bn(g2, be2, m2, v2)
    w2s = w2[:, 0, :, :] * s2[:, None, None]                    # (Cu, 3, 3)
    blocks = []
    for kh in range(3):                                         # kh = dh + 1
        Mk = jnp.zeros((WCu, WCu), jnp.float32)
        for kw in range(3):                                     # kw = dw + 1
            Mk = Mk + jnp.kron(shift_matrix(W, kw - 1),
                               jnp.diag(w2s[:, kh, kw]))
        blocks.append(Mk)
    m_stack = jnp.concatenate(blocks, axis=0).astype(cdt)       # (3*WCu, WCu)
    b2big = jnp.tile(b2, W).reshape(1, WCu)

    # --- conv3: fold BN3 scale; emit directly into (c, w) lanes --------------
    w3d = grouped_1x1_to_dense(w3[:, :, 0, 0], groups)          # (Cu, C)
    s3, b3 = fold_bn(g3, be3, m3, v3)
    w3f = w3d * s3[None, :]                                     # (Cu, C)
    # rows (w', u), cols (c, w) with delta_{w w'}
    b3mat = jnp.einsum('uc,vw->vucw', w3f, eyeW).reshape(WCu, CW).astype(cdt)
    b3big = jnp.repeat(b3, W).reshape(1, CW)                    # lane (c,w)->b3[c]

    # --- lane-dense I/O slab: rows = (n, h), lanes = (c, w) -------------------
    x_lin = jnp.transpose(x_nchw, (0, 2, 1, 3)).reshape(N * H, CW)
    x_lin = x_lin.astype(jnp.float32)

    Nb = _pick_nb(N, H)
    rows_blk = Nb * H

    out = pl.pallas_call(
        functools.partial(unitb_kernel, h=H),
        out_shape=jax.ShapeDtypeStruct((N * H, CW), jnp.float32),
        grid=(N // Nb,),
        in_specs=[
            pl.BlockSpec((rows_blk, CW), lambda i: (i, 0)),     # x slab
            pl.BlockSpec((CW, WCu), lambda i: (0, 0)),          # conv1 weight
            pl.BlockSpec((1, WCu), lambda i: (0, 0)),           # b1
            pl.BlockSpec((3 * WCu, WCu), lambda i: (0, 0)),     # depthwise M
            pl.BlockSpec((1, WCu), lambda i: (0, 0)),           # b2
            pl.BlockSpec((WCu, CW), lambda i: (0, 0)),          # conv3 weight
            pl.BlockSpec((1, CW), lambda i: (0, 0)),            # b3
        ],
        out_specs=pl.BlockSpec((rows_blk, CW), lambda i: (i, 0)),
        compiler_params=pltpu.CompilerParams(
            dimension_semantics=("parallel",)),
    )(x_lin, w1big, b1big, m_stack, b2big, b3mat, b3big)

    return jnp.transpose(out.reshape(N, H, C, W), (0, 2, 1, 3))


# ----------------------------------------------------------------------------
# Pure-JAX reference (lax convs, NCHW) for verification
# ----------------------------------------------------------------------------
def channel_shuffle_ref(x, groups):
    n, c, h, w = x.shape
    x = x.reshape(n, groups, c // groups, h, w)
    x = jnp.transpose(x, (0, 2, 1, 3, 4))
    return x.reshape(n, c, h, w)


def unitb_ref(x, params, groups, eps=1e-5):
    (w1, g1, be1, m1, v1,
     w2, g2, be2, m2, v2,
     w3, g3, be3, m3, v3) = params
    dn = ("NCHW", "OIHW", "NCHW")

    def bn(y, g, b, m, v):
        sc = g / jnp.sqrt(v + eps)
        return y * sc[None, :, None, None] + (b - m * sc)[None, :, None, None]

    y = lax.conv_general_dilated(x, w1, (1, 1), [(0, 0), (0, 0)],
                                 dimension_numbers=dn, feature_group_count=groups)
    y = jnp.maximum(bn(y, g1, be1, m1, v1), 0.0)
    y = channel_shuffle_ref(y, groups)
    y = lax.conv_general_dilated(y, w2, (1, 1), [(1, 1), (1, 1)],
                                 dimension_numbers=dn,
                                 feature_group_count=y.shape[1])
    y = bn(y, g2, be2, m2, v2)
    y = lax.conv_general_dilated(y, w3, (1, 1), [(0, 0), (0, 0)],
                                 dimension_numbers=dn, feature_group_count=groups)
    y = bn(y, g3, be3, m3, v3)
    return jnp.maximum(y + x, 0.0)


# ----------------------------------------------------------------------------
if __name__ == "__main__":
    N, C, H, W = 8, 16, 8, 8          # Nb=4 -> grid=(2,), 128-lane blocks
    groups = 2
    Cu = C // 4

    key = jax.random.PRNGKey(0)
    ks = jax.random.split(key, 4)
    x = jax.random.normal(ks[0], (N, C, H, W), jnp.float32)

    # deterministic "trained" parameters (torch weight shape conventions)
    w1 = 0.25 * jax.random.normal(ks[1], (Cu, C // groups, 1, 1), jnp.float32)
    w2 = 0.25 * jax.random.normal(ks[2], (Cu, 1, 3, 3), jnp.float32)
    w3 = 0.25 * jax.random.normal(ks[3], (C, Cu // groups, 1, 1), jnp.float32)

    def bn_params(c, off):
        gamma = 1.0 + 0.05 * jnp.arange(c, dtype=jnp.float32)
        beta = 0.02 * jnp.arange(c, dtype=jnp.float32) - 0.1 * off
        mean = 0.01 * jnp.arange(c, dtype=jnp.float32)
        var = 1.0 + 0.03 * jnp.arange(c, dtype=jnp.float32)
        return gamma, beta, mean, var

    g1, be1, m1, v1 = bn_params(Cu, 1)
    g2, be2, m2, v2 = bn_params(Cu, 2)
    g3, be3, m3, v3 = bn_params(C, 3)

    params = (w1, g1, be1, m1, v1,
              w2, g2, be2, m2, v2,
              w3, g3, be3, m3, v3)

    out = unitb_pallas(x, params, groups)
    out = jax.block_until_ready(out)

    ref = unitb_ref(x, params, groups)
    assert out.shape == (N, C, H, W)
    # matmul operands may run in bf16 on TPU -> relaxed (still bug-catching) tol
    assert jnp.allclose(out, ref, rtol=5e-2, atol=5e-2), (
        float(jnp.max(jnp.abs(out - ref))))

    print("KERNEL_OK")
</pallas_src>

<mosaic_0001>
module attributes {stable_mosaic.version = 11 : i64} {
  func.func @unitb_kernel(%arg0: i32, %arg1: memref<32x128xf32, #tpu.memory_space<vmem>>, %arg2: memref<128x32xf32, #tpu.memory_space<vmem>>, %arg3: memref<1x32xf32, #tpu.memory_space<vmem>>, %arg4: memref<96x32xf32, #tpu.memory_space<vmem>>, %arg5: memref<1x32xf32, #tpu.memory_space<vmem>>, %arg6: memref<32x128xf32, #tpu.memory_space<vmem>>, %arg7: memref<1x128xf32, #tpu.memory_space<vmem>>, %arg8: memref<32x128xf32, #tpu.memory_space<vmem>>) attributes {dimension_semantics = [#tpu.dimension_semantics<parallel>], iteration_bounds = array<i64: 2>, scalar_prefetch = 0 : i64, scratch_operands = 0 : i64, tpu.core_type = #tpu.core_type<tc>, window_params = [{transform_indices = @transform_0, window_bounds = array<i64: 32, 128>}, {pipeline_mode = #tpu.pipeline_mode<synchronous>, transform_indices = @transform_1, window_bounds = array<i64: 128, 32>}, {pipeline_mode = #tpu.pipeline_mode<synchronous>, transform_indices = @transform_2, window_bounds = array<i64: 1, 32>}, {pipeline_mode = #tpu.pipeline_mode<synchronous>, transform_indices = @transform_3, window_bounds = array<i64: 96, 32>}, {pipeline_mode = #tpu.pipeline_mode<synchronous>, transform_indices = @transform_4, window_bounds = array<i64: 1, 32>}, {pipeline_mode = #tpu.pipeline_mode<synchronous>, transform_indices = @transform_5, window_bounds = array<i64: 32, 128>}, {pipeline_mode = #tpu.pipeline_mode<synchronous>, transform_indices = @transform_6, window_bounds = array<i64: 1, 128>}, {transform_indices = @transform_7, window_bounds = array<i64: 32, 128>}]} {
    %c0 = arith.constant 0 : index
    %c0_0 = arith.constant 0 : index
    %0 = vector.load %arg1[%c0, %c0_0] : memref<32x128xf32, #tpu.memory_space<vmem>>, vector<32x128xf32>
    %c0_1 = arith.constant 0 : index
    %c0_2 = arith.constant 0 : index
    %1 = vector.load %arg2[%c0_1, %c0_2] : memref<128x32xf32, #tpu.memory_space<vmem>>, vector<128x32xf32>
    %cst = arith.constant dense<0.000000e+00> : vector<32x32xf32>
    %2 = tpu.matmul %0, %1, %cst {dimension_numbers = #tpu.dot_dimension_numbers<[1], [0], [0], [1], [0, 0, 1, 1], [], []>} : vector<32x128xf32>, vector<128x32xf32>, vector<32x32xf32> -> vector<32x32xf32>
    %c0_3 = arith.constant 0 : index
    %c0_4 = arith.constant 0 : index
    %3 = vector.load %arg3[%c0_3, %c0_4] : memref<1x32xf32, #tpu.memory_space<vmem>>, vector<1x32xf32>
    %4 = vector.broadcast %3 : vector<1x32xf32> to vector<32x32xf32>
    %5 = arith.addf %2, %4 : vector<32x32xf32>
    %cst_5 = arith.constant 0.000000e+00 : f32
    %6 = vector.broadcast %cst_5 : f32 to vector<32x32xf32>
    %7 = arith.maximumf %5, %6 : vector<32x32xf32>
    %cst_6 = arith.constant 0.000000e+00 : f32
    %8 = vector.broadcast %cst_6 : f32 to vector<1x32xf32>
    %9 = vector.extract_strided_slice %7 {offsets = [0, 0], sizes = [31, 32], strides = [1, 1]} : vector<32x32xf32> to vector<31x32xf32>
    %10 = tpu.concatenate %8, %9 in 0 : vector<1x32xf32>, vector<31x32xf32> -> vector<32x32xf32>
    %11 = vector.extract_strided_slice %7 {offsets = [1, 0], sizes = [31, 32], strides = [1, 1]} : vector<32x32xf32> to vector<31x32xf32>
    %12 = tpu.concatenate %11, %8 in 0 : vector<31x32xf32>, vector<1x32xf32> -> vector<32x32xf32>
    %13 = tpu.iota {dimensions = array<i32: 0>} : vector<32x32xi32>
    %c8_i32 = arith.constant 8 : i32
    %c0_i32 = arith.constant 0 : i32
    %14 = arith.cmpi eq, %c8_i32, %c0_i32 : i32
    %c1_i32 = arith.constant 1 : i32
    %15 = arith.select %14, %c1_i32, %c8_i32 : i32
    %16 = vector.broadcast %15 : i32 to vector<32x32xi32>
    %17 = arith.remsi %13, %16 : vector<32x32xi32>
    %c0_i32_7 = arith.constant 0 : i32
    %18 = vector.broadcast %c0_i32_7 : i32 to vector<32x32xi32>
    %19 = arith.cmpi ne, %17, %18 : vector<32x32xi32>
    %c0_i32_8 = arith.constant 0 : i32
    %20 = vector.broadcast %c0_i32_8 : i32 to vector<32x32xi32>
    %21 = arith.cmpi slt, %17, %20 : vector<32x32xi32>
    %c0_i32_9 = arith.constant 0 : i32
    %22 = arith.cmpi slt, %15, %c0_i32_9 : i32
    %23 = vector.broadcast %22 : i1 to vector<32x32xi1>
    %24 = vector.broadcast %23 : vector<32x32xi1> to vector<32x32xi1>
    %25 = arith.xori %21, %24 : vector<32x32xi1>
    %26 = arith.andi %25, %19 : vector<32x32xi1>
    %27 = vector.broadcast %15 : i32 to vector<32x32xi32>
    %28 = arith.addi %17, %27 : vector<32x32xi32>
    %29 = arith.select %26, %28, %17 : vector<32x32xi1>, vector<32x32xi32>
    %c0_i32_10 = arith.constant 0 : i32
    %30 = vector.broadcast %c0_i32_10 : i32 to vector<32x32xi32>
    %31 = arith.cmpi eq, %29, %30 : vector<32x32xi32>
    %cst_11 = arith.constant 0.000000e+00 : f32
    %32 = vector.broadcast %cst_11 : f32 to vector<32x32xf32>
    %33 = arith.select %31, %32, %10 : vector<32x32xi1>, vector<32x32xf32>
    %c7_i32 = arith.constant 7 : i32
    %34 = vector.broadcast %c7_i32 : i32 to vector<32x32xi32>
    %35 = arith.cmpi eq, %29, %34 : vector<32x32xi32>
    %cst_12 = arith.constant 0.000000e+00 : f32
    %36 = vector.broadcast %cst_12 : f32 to vector<32x32xf32>
    %37 = arith.select %35, %36, %12 : vector<32x32xi1>, vector<32x32xf32>
    %38 = tpu.concatenate %33, %7, %37 in 1 : vector<32x32xf32>, vector<32x32xf32>, vector<32x32xf32> -> vector<32x96xf32>
    %c0_13 = arith.constant 0 : index
    %c0_14 = arith.constant 0 : index
    %39 = vector.load %arg4[%c0_13, %c0_14] : memref<96x32xf32, #tpu.memory_space<vmem>>, vector<96x32xf32>
    %cst_15 = arith.constant dense<0.000000e+00> : vector<32x32xf32>
    %40 = tpu.matmul %38, %39, %cst_15 {dimension_numbers = #tpu.dot_dimension_numbers<[1], [0], [0], [1], [0, 0, 1, 1], [], []>} : vector<32x96xf32>, vector<96x32xf32>, vector<32x32xf32> -> vector<32x32xf32>
    %c0_16 = arith.constant 0 : index
    %c0_17 = arith.constant 0 : index
    %41 = vector.load %arg5[%c0_16, %c0_17] : memref<1x32xf32, #tpu.memory_space<vmem>>, vector<1x32xf32>
    %42 = vector.broadcast %41 : vector<1x32xf32> to vector<32x32xf32>
    %43 = arith.addf %40, %42 : vector<32x32xf32>
    %c0_18 = arith.constant 0 : index
    %c0_19 = arith.constant 0 : index
    %44 = vector.load %arg6[%c0_18, %c0_19] : memref<32x128xf32, #tpu.memory_space<vmem>>, vector<32x128xf32>
    %cst_20 = arith.constant dense<0.000000e+00> : vector<32x128xf32>
    %45 = tpu.matmul %43, %44, %cst_20 {dimension_numbers = #tpu.dot_dimension_numbers<[1], [0], [0], [1], [0, 0, 1, 1], [], []>} : vector<32x32xf32>, vector<32x128xf32>, vector<32x128xf32> -> vector<32x128xf32>
    %c0_21 = arith.constant 0 : index
    %c0_22 = arith.constant 0 : index
    %46 = vector.load %arg7[%c0_21, %c0_22] : memref<1x128xf32, #tpu.memory_space<vmem>>, vector<1x128xf32>
    %47 = vector.broadcast %46 : vector<1x128xf32> to vector<32x128xf32>
    %48 = arith.addf %45, %47 : vector<32x128xf32>
    %49 = arith.addf %48, %0 : vector<32x128xf32>
    %cst_23 = arith.constant 0.000000e+00 : f32
    %50 = vector.broadcast %cst_23 : f32 to vector<32x128xf32>
    %51 = arith.maximumf %49, %50 : vector<32x128xf32>
    %c0_24 = arith.constant 0 : index
    %c0_25 = arith.constant 0 : index
    %52 = vector.load %arg8[%c0_24, %c0_25] : memref<32x128xf32, #tpu.memory_space<vmem>>, vector<32x128xf32>
    tpu.vector_store %arg8[%c0_24, %c0_25], %51 {strides = array<i32>} : memref<32x128xf32, #tpu.memory_space<vmem>>, vector<32x128xf32>,
    return
  }
  func.func @transform_0(%arg0: i32) -> (i32, i32) {
    %c0_i32 = arith.constant 0 : i32
    %c0_i32_0 = arith.constant 0 : i32
    return %arg0, %c0_i32 : i32, i32
  }
  func.func @transform_1(%arg0: i32) -> (i32, i32) {
    %c0_i32 = arith.constant 0 : i32
    %c0_i32_0 = arith.constant 0 : i32
    %c0_i32_1 = arith.constant 0 : i32
    return %c0_i32, %c0_i32_0 : i32, i32
  }
  func.func @transform_2(%arg0: i32) -> (i32, i32) {
    %c0_i32 = arith.constant 0 : i32
    %c0_i32_0 = arith.constant 0 : i32
    %c0_i32_1 = arith.constant 0 : i32
    return %c0_i32, %c0_i32_0 : i32, i32
  }
  func.func @transform_3(%arg0: i32) -> (i32, i32) {
    %c0_i32 = arith.constant 0 : i32
    %c0_i32_0 = arith.constant 0 : i32
    %c0_i32_1 = arith.constant 0 : i32
    return %c0_i32, %c0_i32_0 : i32, i32
  }
  func.func @transform_4(%arg0: i32) -> (i32, i32) {
    %c0_i32 = arith.constant 0 : i32
    %c0_i32_0 = arith.constant 0 : i32
    %c0_i32_1 = arith.constant 0 : i32
    return %c0_i32, %c0_i32_0 : i32, i32
  }
  func.func @transform_5(%arg0: i32) -> (i32, i32) {
    %c0_i32 = arith.constant 0 : i32
    %c0_i32_0 = arith.constant 0 : i32
    %c0_i32_1 = arith.constant 0 : i32
    return %c0_i32, %c0_i32_0 : i32, i32
  }
  func.func @transform_6(%arg0: i32) -> (i32, i32) {
    %c0_i32 = arith.constant 0 : i32
    %c0_i32_0 = arith.constant 0 : i32
    %c0_i32_1 = arith.constant 0 : i32
    return %c0_i32, %c0_i32_0 : i32, i32
  }
  func.func @transform_7(%arg0: i32) -> (i32, i32) {
    %c0_i32 = arith.constant 0 : i32
    %c0_i32_0 = arith.constant 0 : i32
    return %arg0, %c0_i32 : i32, i32
  }
}

</mosaic_0001>

<bundles_post_ra>
// kernel: tile.18
= control target key start
LH: loop header
LB: loop body
LE: loop exit
PB: predicated region body
PF: predicated region fallthrough
CT: control target
= control target key end

     0   :  { %s22_s0 = inlined_call_operand.vmem [shape: f32[4], index: 0, kind: input, shape index: {}]   ;;  %s23_s1 = inlined_call_operand.vmem [shape: f32[8,4], index: 1, kind: output, shape index: {}]  }
   0x1   :  { %v4_v0 = vld [vmem:[%s22_s0] ss:$0 sm:$0xff] }
   0x2   :  { %5 = vst [vmem:[%s23_s1] sm:$0xff] %v4_v0 }

// kernel: tile.19
= control target key start
LH: loop header
LB: loop body
LE: loop exit
PB: predicated region body
PF: predicated region fallthrough
CT: control target
= control target key end

     0   :  { %s67_s10 = smov 28   ;;  %s68_s11 = smov 20   ;;  %vm3_vm0 = vcmask 31744   ;;  %vm9_vm1 = vcmask 261344   ;;  %vm15_vm2 = vcmask 228544   ;;  %vm21_vm3 = vcmask 195744   ;;  %s111_s0 = inlined_call_operand.vmem [shape: f32[8,4], index: 0, kind: input, shape index: {}]   ;;  %s112_s1 = inlined_call_operand.vmem [shape: f32[1,32], index: 1, kind: output, shape index: {}]  }
   0x1   :  { %v53_v0 = vld [vmem:[%s111_s0 + $0x7] sm:$0x1]   ;;  %v55_v1 = vld [vmem:[%s111_s0 + $0x5] sm:$0x1]   ;;  %v54_v2 = vld [vmem:[%s111_s0 + $0x6] sm:$0x1]  }
   0x2   :  { %7 = vrot.lane.b32.xlu0 %v53_v0, %s67_s10  ;;  %19 = vrot.lane.b32.xlu1 %v55_v1, %s68_s11  ;;  %v56_v3 = vld [vmem:[%s111_s0 + $0x4] sm:$0x1]   ;;  %v2_v4 = vld [vmem:[%s111_s0] sm:$0x1]   ;;  %s69_s18 = smov 24   ;;  %s70_s19 = smov 16  }
   0x3   :  { %4 = vst.msk [vmem:[#allocation0] sm:$0x1] %vm3_vm0, %v2_v4   ;;  %v57_v5 = vld [vmem:[%s111_s0 + $0x3] sm:$0x1]   ;;  %v58_v6 = vld [vmem:[%s111_s0 + $0x2] sm:$0x1]  }
   0x4   :  { %s71_s24 = smov 12   ;;  %s72_s25 = smov 8   ;;  %v59_v7 = vld [vmem:[%s111_s0 + $0x1] sm:$0x1]   ;;  %vm27_vm4 = vcmask 162944   ;;  %vm33_vm5 = vcmask 130144  }
   0x5   :  { %s73_s0 = smov 4   ;;  %vm39_vm6 = vcmask 97344   ;;  %vm45_vm7 = vcmask 64544  }
   0x6   :  { %13 = vrot.lane.b32.xlu0 %v54_v2, %s69_s18  ;;  %25 = vrot.lane.b32.xlu1 %v56_v3, %s70_s19 }
   0xa   :  { %31 = vrot.lane.b32.xlu0 %v57_v5, %s71_s24  ;;  %37 = vrot.lane.b32.xlu1 %v58_v6, %s72_s25 }
   0xe   :  { %43 = vrot.lane.b32.xlu0 %v59_v7, %s73_s0 }
  0x74   :  { %v8_v8 = vpop.permute.xlu0 %7   ;;  %v20_v9 = vpop.permute.xlu1 %19  }
  0x75   :  { %10 = vst.msk [vmem:[#allocation0] sm:$0x1] %vm9_vm1, %v8_v8  }
  0x78   :  { %v14_v10 = vpop.permute.xlu0 %13   ;;  %v26_v11 = vpop.permute.xlu1 %25  }
  0x79   :  { %16 = vst.msk [vmem:[#allocation0] sm:$0x1] %vm15_vm2, %v14_v10  }
  0x7a   :  { %22 = vst.msk [vmem:[#allocation0] sm:$0x1] %vm21_vm3, %v20_v9  }
  0x7b   :  { %28 = vst.msk [vmem:[#allocation0] sm:$0x1] %vm27_vm4, %v26_v11  }
  0x7c   :  { %v32_v12 = vpop.permute.xlu0 %31   ;;  %v38_v13 = vpop.permute.xlu1 %37  }
  0x7d   :  { %34 = vst.msk [vmem:[#allocation0] sm:$0x1] %vm33_vm5, %v32_v12  }
  0x7e   :  { %40 = vst.msk [vmem:[#allocation0] sm:$0x1] %vm39_vm6, %v38_v13  }
  0x80   :  { %v44_v14 = vpop.permute.xlu0 %43  }
  0x81   :  { %46 = vst.msk [vmem:[#allocation0] sm:$0x1] %vm45_vm7, %v44_v14  }
  0x88   :  { %v50_v15 = vld [vmem:[#allocation0] sm:$0x1] }
  0x89   :  { %52 = vst [vmem:[%s112_s1] sm:$0x1] %v50_v15 }

// kernel: unitb_pallas.1
= control target key start
LH: loop header
LB: loop body
LE: loop exit
PB: predicated region body
PF: predicated region fallthrough
CT: control target
= control target key end

     0   :  { %s1100_s24 = smov 0   ;;  %s1309_s0 = inlined_call_operand.vmem [shape: f32[64,128], index: 0, kind: input, shape index: {}]   ;;  %s1310_s1 = inlined_call_operand.vmem [shape: f32[128,32], index: 1, kind: input, shape index: {}]   ;;  %s1311_s2 = inlined_call_operand.vmem [shape: f32[1,32], index: 2, kind: input, shape index: {}]   ;;  %s1312_s3 = inlined_call_operand.vmem [shape: f32[96,32], index: 3, kind: input, shape index: {}]   ;;  %s1313_s4 = inlined_call_operand.vmem [shape: f32[1,32], index: 4, kind: input, shape index: {}]   ;;  %s1314_s5 = inlined_call_operand.vmem [shape: f32[32,128], index: 5, kind: input, shape index: {}]   ;;  %s1315_s6 = inlined_call_operand.vmem [shape: f32[1,128], index: 6, kind: input, shape index: {}]   ;;  %s1316_s7 = inlined_call_operand.vmem [shape: f32[64,128], index: 7, kind: output, shape index: {}]  }
   0x1 LB: > { %s828_s25 = sadd.s32 4294967295, %s1056_s24   ;;  %p832_p0 = scmp.ge.s32.totalorder %s1056_s24, 1  ;;  %s1056_s24 = sphi %s1100_s24, %s17_s24  }
   0x2   : > { %p238_p1 = scmp.lt.s32.totalorder %s1056_s24, 3 }
   0x4   : > { %p239_p2 = pnand %p832_p0, %p238_p1 }
   0x5   : > { %v286_v0 = vld [vmem:[%s1310_s1] sm:$0xff] (!%p239_p2)  ;;  %v287_v1 = vld [vmem:[%s1310_s1 + $0x8] sm:$0xff] (!%p239_p2)  ;;  %v288_v2 = vld [vmem:[%s1310_s1 + $0x10] sm:$0xff] (!%p239_p2)  ;;  %s833_s9 = sshll.u32 (!%p239_p2), %s828_s25, 2  ;;  %v428_v37 = vlaneseq (!%p239_p2)  ;;  %vm415_vm0 = vcmask (!%p239_p2), 1046528   ;;  %vm402_vm1 = vcmask (!%p239_p2), 1040384  }
   0x6   : > { %242 = sbr.rel (%p239_p2) target bundleno = 824 (0x338), region = 48  ;;  %v976_v3 = vpack.c.bf16 (!%p239_p2), %v287_v1, %v286_v0  ;;  %v289_v4 = vld [vmem:[%s1310_s1 + $0x18] sm:$0xff] (!%p239_p2)  ;;  %p271_p3 = scmp.lt.s32.totalorder (!%p239_p2), %s833_s9, 7  ;;  %v290_v6 = vld [vmem:[%s1310_s1 + $0x20] sm:$0xff] (!%p239_p2)  ;;  %v291_v7 = vld [vmem:[%s1310_s1 + $0x28] sm:$0xff] (!%p239_p2)  ;;  %vm530_vm10 = vcmask (!%p239_p2), 523264  }
   0x7   : > { %v980_v5 = vpack.c.bf16 (!%p239_p2), %v289_v4, %v288_v2  ;;  %v984_v8 = vpack.c.bf16 (!%p239_p2), %v291_v7, %v290_v6  ;;  %v292_v9 = vld [vmem:[%s1310_s1 + $0x30] sm:$0xff] (!%p239_p2)  ;;  %v293_v10 = vld [vmem:[%s1310_s1 + $0x38] sm:$0xff] (!%p239_p2)  ;;  %v294_v13 = vld [vmem:[%s1310_s1 + $0x40] sm:$0xff] (!%p239_p2)  ;;  %v429_v41 = vshrl.u32 (!%p239_p2), %v428_v37, 7  ;;  %s1058_s28 = smov (!%p239_p2), 32   ;;  %s1059_s10 = smov (!%p239_p2), 64  }
   0x8   : > { %977 = vmatprep.subr.bf16.mxu0 (!%p239_p2), %v976_v3  ;;  %v988_v12 = vpack.c.bf16 (!%p239_p2), %v293_v10, %v292_v9  ;;  %v295_v14 = vld [vmem:[%s1310_s1 + $0x48] sm:$0xff] (!%p239_p2)  ;;  %v296_v16 = vld [vmem:[%s1310_s1 + $0x50] sm:$0xff] (!%p239_p2)  ;;  %v297_v17 = vld [vmem:[%s1310_s1 + $0x58] sm:$0xff] (!%p239_p2)  ;;  %vm525_vm11 = vcmask (!%p239_p2), 261120   ;;  %vm554_vm12 = vcmask (!%p239_p2), 785408  }
   0x9   : > { %979 = vmatpush3.bf16.msra.mxu0 (!%p239_p2), %v976_v3  ;;  %v992_v15 = vpack.c.bf16 (!%p239_p2), %v295_v14, %v294_v13  ;;  %v996_v18 = vpack.c.bf16 (!%p239_p2), %v297_v17, %v296_v16  ;;  %v298_v19 = vld [vmem:[%s1310_s1 + $0x60] sm:$0xff] (!%p239_p2)  ;;  %v299_v20 = vld [vmem:[%s1310_s1 + $0x68] sm:$0xff] (!%p239_p2)  ;;  %v300_v22 = vld [vmem:[%s1310_s1 + $0x70] sm:$0xff] (!%p239_p2)  ;;  %v430_v46 = vadd.s32 (!%p239_p2), 8, %v429_v41  ;;  %v432_v53 = vadd.s32 (!%p239_p2), 24, %v429_v41 }
   0xa   : > { %981 = vmatprep.subr.bf16.mxu0 (!%p239_p2), %v980_v5  ;;  %v1000_v21 = vpack.c.bf16 (!%p239_p2), %v299_v20, %v298_v19  ;;  %v301_v23 = vld [vmem:[%s1310_s1 + $0x78] sm:$0xff] (!%p239_p2)  ;;  %v535_v28 = vld [vmem:[%s1312_s3] sm:$0xff] (!%p239_p2)  ;;  %v536_v29 = vld [vmem:[%s1312_s3 + $0x8] sm:$0xff] (!%p239_p2)  ;;  %v437_v57 = vand.u32 (!%p239_p2), 7, %v429_v41  ;;  %v431_v58 = vadd.s32 (!%p239_p2), 16, %v429_v41 }
   0xb   : > { %v1004_v24 = vpack.c.bf16 (!%p239_p2), %v301_v23, %v300_v22  ;;  %v537_v30 = vld [vmem:[%s1312_s3 + $0x10] sm:$0xff] (!%p239_p2)  ;;  %v1008_v31 = vpack.c.bf16 (!%p239_p2), %v536_v29, %v535_v28  ;;  %v538_v32 = vld [vmem:[%s1312_s3 + $0x18] sm:$0xff] (!%p239_p2)  ;;  %v539_v34 = vld [vmem:[%s1312_s3 + $0x20] sm:$0xff] (!%p239_p2)  ;;  %v444_v55 = vand.u32 (!%p239_p2), 7, %v430_v46  ;;  %v458_v1 = vand.u32 (!%p239_p2), 7, %v432_v53 }
   0xc   : > { %v1012_v33 = vpack.c.bf16 (!%p239_p2), %v538_v32, %v537_v30  ;;  %v540_v35 = vld [vmem:[%s1312_s3 + $0x28] sm:$0xff] (!%p239_p2)  ;;  %v541_v38 = vld [vmem:[%s1312_s3 + $0x30] sm:$0xff] (!%p239_p2)  ;;  %v542_v39 = vld [vmem:[%s1312_s3 + $0x38] sm:$0xff] (!%p239_p2)  ;;  %vm1226_vm3 = vcmp.eq.s32.totalorder (!%p239_p2), %v437_v57, 7  ;;  %vm1230_vm4 = vcmp.eq.s32.totalorder (!%p239_p2), %v437_v57, 0 }
   0xd   : > { %s1328_s9 = smov (!%p271_p3, %s833_s9), 7  ;;  %983 = vmatpush3.bf16.msra.mxu0 %v980_v5  ;;  %1009 = vmatprep.subr.bf16.mxu1 %v1008_v31  ;;  %v1016_v36 = vpack.c.bf16 %v540_v35, %v539_v34  ;;  %v1020_v40 = vpack.c.bf16 %v542_v39, %v541_v38  ;;  %v543_v42 = vld [vmem:[%s1312_s3 + $0x40] sm:$0xff]  ;;  %v544_v43 = vld [vmem:[%s1312_s3 + $0x48] sm:$0xff]  ;;  %v545_v47 = vld [vmem:[%s1312_s3 + $0x50] sm:$0xff]  ;;  %vm1222_vm2 = vcmp.eq.s32.totalorder %v444_v55, 0  ;;  %vm1241_vm5 = vcmp.eq.s32.totalorder %v458_v1, 0 }
   0xe   : > { %s834_s16 = sshll.u32 %s1328_s9, 3  ;;  %985 = vmatprep.subr.bf16.mxu0 %v984_v8  ;;  %1011 = vmatpush3.bf16.msra.mxu1 %v1008_v31  ;;  %v1024_v44 = vpack.c.bf16 %v544_v43, %v543_v42  ;;  %v837_v45 = vld [vmem:[%s1311_s2] ss:$0 sm:$0xff]  ;;  %v546_v48 = vld [vmem:[%s1312_s3 + $0x58] sm:$0xff]  ;;  %v653_v20 = vld [vmem:[%s1314_s5 + $0x8] sm:$0xff]  ;;  %vm490_vm8 = vcmp.eq.s32.totalorder %v444_v55, 7 }
   0xf   : > { %s1140_s23 = scalar_lea.vmem %s1309_s0, %s834_s16  ;;  %1013 = vmatprep.subr.bf16.mxu1 %v1012_v33  ;;  %v1028_v50 = vpack.c.bf16 %v546_v48, %v545_v47  ;;  %v652_v19 = vld [vmem:[%s1314_s5] sm:$0xff]  ;;  %vm492_vm9 = vcmp.eq.s32.totalorder %v458_v1, 7  ;;  %v655_v57 = vld [vmem:[%s1314_s5 + $0x18] sm:$0xff]  ;;  %s280_s22 = scalar_lea.vmem %s1316_s7, %s834_s16 }
  0x10   : > { %v1143_v11 = vld [vmem:[%s1140_s23] sm:$0xff]  ;;  %v1171_v25 = vld [vmem:[%s1140_s23 + $0x8] sm:$0xff]  ;;  %v1174_v26 = vld [vmem:[%s1140_s23 + $0x10] sm:$0xff] }
  0x11   : > { %926 = vmatprep.mubr.f32.mxu0 %v1143_v11  ;;  %987 = vmatpush3.bf16.msra.mxu0 %v984_v8  ;;  %v1179_v27 = vld [vmem:[%s1140_s23 + $0x18] sm:$0xff]  ;;  %v451_v8 = vand.u32 7, %v431_v58 }
  0x12   : > { %989 = vmatprep.subr.bf16.mxu0 %v988_v12  ;;  %1015 = vmatpush3.bf16.msra.mxu1 %v1012_v33 }
  0x13   : > { %1017 = vmatprep.subr.bf16.mxu1 %v1016_v36  ;;  %vm1253_vm6 = vcmp.eq.s32.totalorder %v451_v8, 0  ;;  %vm491_vm7 = vcmp.eq.s32.totalorder %v451_v8, 7 }
  0x15   : > { %991 = vmatpush3.bf16.msra.mxu0 %v988_v12 }
  0x16   : > { %993 = vmatprep.subr.bf16.mxu0 %v992_v15  ;;  %1019 = vmatpush3.bf16.msra.mxu1 %v1016_v36 }
  0x17   : > { %1021 = vmatprep.subr.bf16.mxu1 %v1020_v40 }
  0x19   : > { %995 = vmatpush3.bf16.msra.mxu0 %v992_v15 }
  0x1a   : > { %997 = vmatprep.subr.bf16.mxu0 %v996_v18  ;;  %1023 = vmatpush3.bf16.msra.mxu1 %v1020_v40 }
  0x1b   : > { %1025 = vmatprep.subr.bf16.mxu1 %v1024_v44 }
  0x1d   : > { %999 = vmatpush3.bf16.msra.mxu0 %v996_v18 }
  0x1e   : > { %1001 = vmatprep.subr.bf16.mxu0 %v1000_v21  ;;  %1027 = vmatpush3.bf16.msra.mxu1 %v1024_v44 }
  0x1f   : > { %1029 = vmatprep.subr.bf16.mxu1 %v1028_v50 }
  0x21   : > { %1003 = vmatpush3.bf16.msra.mxu0 %v1000_v21 }
  0x22   : > { %1005 = vmatprep.subr.bf16.mxu0 %v1004_v24  ;;  %1031 = vmatpush3.bf16.msra.mxu1 %v1028_v50 }
  0x25   : > { %1007 = vmatpush3.bf16.msra.mxu0 %v1004_v24  ;;  %v1032_v24 = vpack.c.bf16 %v653_v20, %v652_v19 }
  0x27   : > { %1033 = vmatprep.subr.bf16.mxu1 %v1032_v24 }
  0x28   : > { %927 = vmatmul.mubr.f32.vlgmr.msra.gmra.mrb[0].mxu0 %v1171_v25 }
  0x29   : > { %929 = vmatprep.mubr.f32.mxu0 %v1174_v26 }
  0x2c   : > { %930 = vmatmul.mubr.f32.gmra.mrb[2].mxu0 %v1179_v27 }
  0xfb   : > { %v928_v49 = vpop.f32.mrb[0].mxu0 }
  0xfc   : > { %v381_v51 = vadd.f32 %v928_v49, %v837_v45  ;;  %v375_v52 = vpop.f32.mrb[1].mxu0 }
  0xfd   : > { %v376_v54 = vadd.f32 %v837_v45, %v375_v52 }
  0xfe   : > { %v395_v56 = vmax.f32 %v381_v51, 0.0 }
  0xff   : > { %v394_v59 = vmax.f32 %v376_v54, 0.0  ;;  %v931_v60 = vpop.f32.mrb[2].mxu0 }
 0x100   : > { %v404_v61 = vrot.slane %v395_v56, 7  ;;  %v417_v62 = vrot.slane %v395_v56, 1  ;;  %v391_v63 = vadd.f32 %v931_v60, %v837_v45  ;;  %499 = vrot.lane.b32.xlu0 %v395_v56, %s1058_s28  ;;  %v385_v0 = vpop.f32.mrb[3].mxu0  ;;  %v654_v56 = vld [vmem:[%s1314_s5 + $0x10] sm:$0xff] }
 0x101   : > { %v403_v2 = vrot.slane %v394_v59, 7  ;;  %v416_v3 = vrot.slane %v394_v59, 1  ;;  %v386_v4 = vadd.f32 %v837_v45, %v385_v0  ;;  %v1036_v58 = vpack.c.bf16 %v655_v57, %v654_v56 }
 0x102   : > { %v397_v6 = vmax.f32 %v391_v63, 0.0 }
 0x103   : > { %v396_v10 = vmax.f32 %v386_v4, 0.0  ;;  %v418_v12 = vsel %vm415_vm0, %v416_v3, %v417_v62  ;;  %v405_v13 = vsel %vm402_vm1, %v403_v2, %v404_v61  ;;  %v414_v14 = vsel %vm402_vm1, 0.0, %v403_v2  ;;  %v843_v4 = vld [vmem:[%s1315_s6] ss:$0 sm:$0xff] }
 0x104   : > { %v408_v15 = vrot.slane %v397_v6, 7  ;;  %v421_v16 = vrot.slane %v397_v6, 1  ;;  %503 = vrot.lane.b32.xlu1 %v397_v6, %s1058_s28  ;;  %497 = vrot.lane.b32.xlu0 %v394_v59, %s1058_s28  ;;  %v486_v17 = vsel %vm1222_vm2, 0.0, %v405_v13  ;;  %v485_v23 = vsel %vm1230_vm4, 0.0, %v414_v14  ;;  %v838_v59 = vld [vmem:[%s1313_s4] ss:$0 sm:$0xff] }
 0x105   : > { %v406_v21 = vrot.slane %v396_v10, 7  ;;  %v419_v22 = vrot.slane %v396_v10, 1  ;;  %v493_v29 = vsel %vm1226_vm3, 0.0, %v418_v12 }
 0x106   : > { %v427_v38 = vsel %vm415_vm0, %v421_v16, 0.0 }
 0x107   : > { %v422_v30 = vsel %vm415_vm0, %v419_v22, %v421_v16  ;;  %v420_v31 = vsel %vm415_vm0, %v417_v62, %v419_v22  ;;  %v409_v32 = vsel %vm402_vm1, %v406_v21, %v408_v15  ;;  %v407_v34 = vsel %vm402_vm1, %v404_v61, %v406_v21 }
 0x108   : > { %501 = vrot.lane.b32.xlu0 %v396_v10, %s1058_s28  ;;  %513 = vrot.lane.b32.xlu1 %v493_v29, %s1059_s10  ;;  %v488_v33 = vsel %vm1241_vm5, 0.0, %v409_v32  ;;  %v487_v35 = vsel %vm1253_vm6, 0.0, %v407_v34  ;;  %v495_v36 = vsel %vm491_vm7, 0.0, %v422_v30  ;;  %v494_v37 = vsel %vm490_vm8, 0.0, %v420_v31 }
 0x109   : > { %v496_v39 = vsel %vm492_vm9, 0.0, %v427_v38 }
 0x10c   : > { %517 = vrot.lane.b32.xlu0 %v495_v36, %s1059_s10  ;;  %515 = vrot.lane.b32.xlu1 %v494_v37, %s1059_s10 }
 0x110   : > { %519 = vrot.lane.b32.xlu1 %v496_v39, %s1059_s10 }
 0x172   : > { %v500_v40 = vpop.permute.xlu0 %499 }
 0x173   : > { %v527_v47 = vsel %vm525_vm11, %v486_v17, %v500_v40 }
 0x176   : > { %v504_v41 = vpop.permute.xlu1 %503  ;;  %v498_v42 = vpop.permute.xlu0 %497 }
 0x177   : > { %v526_v43 = vsel %vm525_vm11, %v485_v23, %v498_v42  ;;  %v529_v53 = vsel %vm525_vm11, %v488_v33, %v504_v41 }
 0x17a   : > { %v502_v44 = vpop.permute.xlu0 %501  ;;  %v514_v45 = vpop.permute.xlu1 %513 }
 0x17b   : > { %v531_v46 = vsel %vm530_vm10, %v526_v43, %v514_v45  ;;  %v528_v48 = vsel %vm525_vm11, %v487_v35, %v502_v44 }
 0x17c   : > { %956 = vmatprep.mubr.msk.f32.mxu1 %vm554_vm12, %v531_v46 }
 0x17e   : > { %v518_v49 = vpop.permute.xlu0 %517  ;;  %v516_v50 = vpop.permute.xlu1 %515 }
 0x17f   : > { %v533_v51 = vsel %vm530_vm10, %v528_v48, %v518_v49  ;;  %v532_v52 = vsel %vm530_vm10, %v527_v47, %v516_v50 }
 0x180   : > { %957 = vmatmul.mubr.msk.f32.vlgmr.msra.gmra.mrb[0].mxu1 %vm554_vm12, %v532_v52 }
 0x181   : > { %959 = vmatprep.mubr.msk.f32.mxu1 %vm554_vm12, %v533_v51  ;;  %1035 = vmatpush3.bf16.msra.mxu1 %v1032_v24 }
 0x182   : > { %v520_v54 = vpop.permute.xlu1 %519  ;;  %1037 = vmatprep.subr.bf16.mxu1 %v1036_v58 }
 0x183   : > { %v534_v55 = vsel %vm530_vm10, %v529_v53, %v520_v54 }
 0x184   : > { %960 = vmatmul.mubr.msk.f32.gmra.mrb[2].mxu1 %vm554_vm12, %v534_v55 }
 0x185   : > { %1039 = vmatpush3.bf16.msra.mxu1 %v1036_v58 }
 0x253   : > { %v958_v60 = vpop.f32.mrb[0].mxu1 }
 0x254   : > { %v633_v61 = vpop.f32.mrb[1].mxu1  ;;  %v639_v63 = vadd.f32 %v958_v60, %v838_v59 }
 0x255   : > { %v634_v62 = vadd.f32 %v838_v59, %v633_v61 }
 0x257   : > { %v961_v0 = vpop.f32.mrb[2].mxu1  ;;  %970 = vmatprep.mubr.msk.f32.mxu1 %vm525_vm11, %v634_v62 }
 0x258   : > { %v643_v1 = vpop.f32.mrb[3].mxu1  ;;  %971 = vmatmul.mubr.msk.f32.vlgmr.msra.gmra.mrb[4].mxu1 %vm525_vm11, %v639_v63  ;;  %v649_v3 = vadd.f32 %v961_v0, %v838_v59 }
 0x259   : > { %v644_v2 = vadd.f32 %v838_v59, %v643_v1 }
 0x25b   : > { %973 = vmatprep.mubr.msk.f32.mxu1 %vm525_vm11, %v644_v2 }
 0x25c   : > { %974 = vmatmul.mubr.msk.f32.gmra.mrb[6].mxu1 %vm525_vm11, %v649_v3 }
 0x32b   : > { %v972_v5 = vpop.f32.mrb[4].mxu1 }
 0x32c   : > { %v747_v6 = vadd.f32 %v972_v5, %v843_v4  ;;  %v741_v7 = vpop.f32.mrb[5].mxu1 }
 0x32d   : > { %v742_v8 = vadd.f32 %v843_v4, %v741_v7 }
 0x32e   : > { %v761_v9 = vadd.f32 %v747_v6, %v1171_v25 }
 0x32f   : > { %v760_v10 = vadd.f32 %v742_v8, %v1143_v11  ;;  %v975_v12 = vpop.f32.mrb[6].mxu1 }
 0x330   : > { %v757_v13 = vadd.f32 %v975_v12, %v843_v4  ;;  %v751_v14 = vpop.f32.mrb[7].mxu1  ;;  %v765_v17 = vmax.f32 %v761_v9, 0.0 }
 0x331   : > { %v764_v15 = vmax.f32 %v760_v10, 0.0  ;;  %v752_v16 = vadd.f32 %v843_v4, %v751_v14 }
 0x332   : > { %v763_v18 = vadd.f32 %v757_v13, %v1179_v27  ;;  %769 = vst [vmem:[%s280_s22 + $0x8] sm:$0xff] %v765_v17 }
 0x333   : > { %768 = vst [vmem:[%s280_s22] sm:$0xff] %v764_v15  ;;  %v762_v19 = vadd.f32 %v752_v16, %v1174_v26 }
 0x334   : > { %v767_v20 = vmax.f32 %v763_v18, 0.0 }
 0x335   : > { %v766_v25 = vmax.f32 %v762_v19, 0.0 }
 0x336   : > { %771 = vst [vmem:[%s280_s22 + $0x18] sm:$0xff] %v767_v20 }
 0x337   : > { %770 = vst [vmem:[%s280_s22 + $0x10] sm:$0xff] %v766_v25 }
 0x338 PF: > { %s17_s24 = sadd.s32 1, %s1056_s24  }
 0x339   : > { %p14_p4 = scmp.ge.s32.totalorder %s17_s24, 4  }
 0x33b   :  { %16 = sbr.rel (!%p14_p4) target bundleno = 1 (0x1), region = 78 }

</bundles_post_ra>
